<compile_context>
chip_gen: v5e
topology: v5e:2x2
jax: 0.10.0
libtpu: 0.0.40
codegen_flags: <defaults>
</compile_context>

<pallas_src>
import jax
import jax.numpy as jnp
from jax.experimental import pallas as pl
from jax.experimental.pallas import tpu as pltpu

BN_EPS = 1e-5
LANE = 128     # everything is padded to one 128-lane tile
SMALL_K = 32   # true contraction depth of layers 2-4 (2*latent = L0 = L1 = 32)
SLAB_ROWS = LANE + 3 * SMALL_K  # 224


# ---------------------------------------------------------------------------
# Kernel
# ---------------------------------------------------------------------------
def bandit_kernel(x_ref, w_ref, p_ref, out_ref):
    """Fused forward for ONE independent call: 4 matmuls + 3 BN(train) + 3 ReLU."""

    # single vld of all per-feature rows; slice the loaded value
    p = p_ref[...]                      # (8, 128) f32
    g1, b1 = p[0:1, :], p[1:2, :]
    g2, b2 = p[2:3, :], p[3:4, :]
    g3, b3 = p[4:5, :], p[5:6, :]
    bias4 = p[6:7, :]                   # [fbias1 | fbias1 @ vw | 0pad]

    inv_n = 1.0 / x_ref.shape[0]

    def bn(h, gamma, beta):
        # BatchNorm1d, training mode, biased variance; one pass over h (f32).
        mean = jnp.sum(h, axis=0, keepdims=True) * inv_n
        mean_sq = jnp.sum(h * h, axis=0, keepdims=True) * inv_n
        var = mean_sq - mean * mean
        scale = gamma * jax.lax.rsqrt(var + BN_EPS)   # EUP rsqrt
        shift = beta - mean * scale
        return h * scale + shift                      # 1 mul + 1 add / elem

    # Static, tile-aligned views into the packed bf16 weight slab.
    w1 = w_ref[0:128, :]                # (128,128) block-diag [sw1; pw1]
    w2 = w_ref[128:160, :]              # (32,128)  block-diag [sw2; pw2]
    w3 = w_ref[160:192, :]              # (32,128)  fw0
    w4 = w_ref[192:224, :]              # (32,128)  [fw1 | fw1 @ vw]

    # fused state/policy embedders: Linear -> BN -> ReLU -> Linear -> BN
    x = x_ref[...].astype(jnp.bfloat16)                 # (B,128) = [state|policy|0]
    h = jnp.dot(x, w1, preferred_element_type=jnp.float32)
    h = jnp.maximum(bn(h, g1, b1), 0.0)
    h = jnp.dot(h[:, :SMALL_K].astype(jnp.bfloat16), w2,
                preferred_element_type=jnp.float32)
    # F.relu(cat([s, z])) -- s/z already live in adjacent lanes.
    h = jnp.maximum(bn(h, g2, b2), 0.0)

    # feature extractor: Linear -> BN -> ReLU -> Linear(+bias) [value head folded in]
    h = jnp.dot(h[:, :SMALL_K].astype(jnp.bfloat16), w3,
                preferred_element_type=jnp.float32)
    h = jnp.maximum(bn(h, g3, b3), 0.0)
    out = jnp.dot(h[:, :SMALL_K].astype(jnp.bfloat16), w4,
                  preferred_element_type=jnp.float32) + bias4
    out_ref[...] = out.astype(out_ref.dtype)            # (B,128) = [phi|value|0]


# ---------------------------------------------------------------------------
# Parameter / input packing (wrapper side, one-time)
# ---------------------------------------------------------------------------
def pack_weight_slabs(params, obs_dim, context_dim, latent_dim, layers_size):
    """Pack all parameters into one (224,128) bf16 weight slab + one (8,128) f32 row slab."""
    L0, L1, L2 = layers_size
    assert obs_dim + context_dim <= LANE
    assert max(L0, L1, L2 + 1, 2 * latent_dim) <= LANE
    # layers 2-4 must fit the 32-deep contraction blocks
    assert 2 * latent_dim <= SMALL_K and L0 <= SMALL_K and L1 <= SMALL_K

    f32 = jnp.float32

    # block-diagonal fused embedder weights (state block first -> cat([s, z]))
    W1 = jnp.zeros((LANE, LANE), f32)
    W1 = W1.at[:obs_dim, :latent_dim].set(params["sw1"])
    W1 = W1.at[obs_dim:obs_dim + context_dim,
               latent_dim:2 * latent_dim].set(params["pw1"])

    W2 = jnp.zeros((SMALL_K, LANE), f32)
    W2 = W2.at[:latent_dim, :latent_dim].set(params["sw2"])
    W2 = W2.at[latent_dim:2 * latent_dim,
               latent_dim:2 * latent_dim].set(params["pw2"])

    W3 = jnp.zeros((SMALL_K, LANE), f32)
    W3 = W3.at[:L0, :L1].set(params["fw0"])

    # fold value head into the last matmul: columns = [phi (L2) | value (1)]
    fw1_aug = jnp.concatenate([params["fw1"], params["fw1"] @ params["vw"]], axis=1)
    fbias_aug = jnp.concatenate([params["fbias1"], params["fbias1"] @ params["vw"]], axis=1)
    W4 = jnp.zeros((SMALL_K, LANE), f32)
    W4 = W4.at[:L1, :L2 + 1].set(fw1_aug)

    # bf16 weight slab: halves weight DMA and feeds the MXU its native dtype.
    w_slab = jnp.concatenate([W1, W2, W3, W4], axis=0).astype(jnp.bfloat16)  # (224,128)

    def row(vals, width):
        # NOTE: padded gamma/beta lanes MUST stay zero so the BN of the
        # zero-padded columns stays exactly zero (var=0 -> rsqrt(eps) is
        # multiplied by gamma=0). Do not pad gammas with 1.
        r = jnp.zeros((1, LANE), f32)
        return r.at[:, :width].set(vals)

    g1 = row(jnp.concatenate([params["sg1"], params["pg1"]], axis=1), 2 * latent_dim)
    b1 = row(jnp.concatenate([params["sb1"], params["pb1"]], axis=1), 2 * latent_dim)
    g2 = row(jnp.concatenate([params["sg2"], params["pg2"]], axis=1), 2 * latent_dim)
    b2 = row(jnp.concatenate([params["sb2"], params["pb2"]], axis=1), 2 * latent_dim)
    g3 = row(params["fg0"], L1)
    b3 = row(params["fb0"], L1)
    bias4 = row(fbias_aug, L2 + 1)
    pad = jnp.zeros((1, LANE), f32)
    p_slab = jnp.concatenate([g1, b1, g2, b2, g3, b3, bias4, pad], axis=0)  # (8, 128)

    return w_slab, p_slab


def pack_activation(state, policy, obs_dim, context_dim):
    """[state | policy | 0pad] -> lane-dense (NB*B, 128) input slab."""
    nb, b = state.shape[:2]
    x = jnp.zeros((nb * b, LANE), jnp.float32)
    x = x.at[:, :obs_dim].set(state.reshape(nb * b, obs_dim))
    x = x.at[:, obs_dim:obs_dim + context_dim].set(policy.reshape(nb * b, context_dim))
    return x


def neural_bandit_forward(state, policy, w_slab, p_slab, obs_dim, context_dim, feat_dim):
    """Fused Pallas forward for a stack of independent calls.

    state: (NB, B, obs_dim), policy: (NB, B, context_dim) -- NB independent
    forward() calls, each with its own BatchNorm batch statistics over B rows.
    Returns (value (NB,B,1), phi (NB,B,feat_dim)).
    """
    squeeze = state.ndim == 2
    if squeeze:
        state, policy = state[None], policy[None]
    nb, b = state.shape[:2]
    # BN stats are taken over all B rows of a block; padded rows would
    # contaminate them, so require an exact sublane-multiple batch.
    assert b % 8 == 0, "per-call batch must be a multiple of 8 (no pad rows allowed in BN)"

    x = pack_activation(state, policy, obs_dim, context_dim)   # (NB*B, 128) f32
    slab_rows = w_slab.shape[0]

    cost = pl.CostEstimate(
        flops=2 * nb * b * (LANE * LANE + 3 * SMALL_K * LANE),   # 1 deep + 3 shallow matmuls
        transcendentals=nb * 3 * LANE,                           # rsqrt per BN feature row
        bytes_accessed=x.size * 4 + w_slab.size * 2 + p_slab.size * 4 + nb * b * LANE * 4,
    )

    # Explicit VMEM budget (double-buffered x/out tiles, resident slabs,
    # in-kernel f32 temporaries) + generous headroom; well under the 32 MiB
    # scoped default on every chip, stated explicitly for the v7x 64 MiB cap.
    vmem_bytes = (4 * b * LANE * 4               # x + out, 2 buffers each
                  + 2 * slab_rows * LANE * 2     # bf16 weight slab
                  + 2 * 8 * LANE * 4             # f32 row slab
                  + 16 * b * LANE * 4)           # f32 temporaries
    vmem_limit = int(max(vmem_bytes + (1 << 20), 8 << 20))

    out = pl.pallas_call(
        bandit_kernel,
        out_shape=jax.ShapeDtypeStruct((nb * b, LANE), jnp.float32),  # [phi | value | 0]
        grid=(nb,),
        in_specs=[
            pl.BlockSpec((b, LANE), lambda i: (i, 0)),          # per-call activations
            pl.BlockSpec((slab_rows, LANE), lambda i: (0, 0)),  # weights: VMEM-resident
            pl.BlockSpec((8, LANE), lambda i: (0, 0)),          # BN rows: VMEM-resident
        ],
        out_specs=pl.BlockSpec((b, LANE), lambda i: (i, 0)),
        compiler_params=pltpu.CompilerParams(
            dimension_semantics=("parallel",),   # v7x: shard calls across 2 TCs
            vmem_limit_bytes=vmem_limit,
        ),
        cost_estimate=cost,
    )(x, w_slab, p_slab)

    out = out.reshape(nb, b, LANE)
    phi = out[..., :feat_dim]
    value = out[..., feat_dim:feat_dim + 1]
    if squeeze:
        phi, value = phi[0], value[0]
    return value, phi


# ---------------------------------------------------------------------------
# Deterministic parameter init (shapes match the PyTorch module; weights are
# stored as (in_features, out_features), i.e. transposed nn.Linear.weight)
# ---------------------------------------------------------------------------
def make_params(key, obs_dim, context_dim, latent_dim, layers_size):
    def nrm(k, shape, scale=0.1):
        return (scale * jax.random.normal(k, shape)).astype(jnp.float32)

    ks = jax.random.split(key, 16)
    L0, L1, L2 = layers_size
    assert L0 == 2 * latent_dim  # state_based: cat([s, z]) has width L0

    params = {
        # policy embedder
        "pw1": nrm(ks[0], (context_dim, latent_dim)),
        "pg1": nrm(ks[1], (1, latent_dim)) + 1.0,
        "pb1": nrm(ks[2], (1, latent_dim)),
        "pw2": nrm(ks[3], (latent_dim, latent_dim)),
        "pg2": nrm(ks[4], (1, latent_dim)) + 1.0,
        "pb2": nrm(ks[5], (1, latent_dim)),
        # state embedder
        "sw1": nrm(ks[6], (obs_dim, latent_dim)),
        "sg1": nrm(ks[7], (1, latent_dim)) + 1.0,
        "sb1": nrm(ks[8], (1, latent_dim)),
        "sw2": nrm(ks[9], (latent_dim, latent_dim)),
        "sg2": nrm(ks[10], (1, latent_dim)) + 1.0,
        "sb2": nrm(ks[11], (1, latent_dim)),
        # feature extractor: [L0 -> L1 (BN+ReLU)] -> [L1 -> L2 (+bias)]
        "fw0": nrm(ks[12], (L0, L1)),
        "fg0": nrm(ks[13], (1, L1)) + 1.0,
        "fb0": nrm(ks[14], (1, L1)),
        "fw1": nrm(ks[15], (L1, L2)),
        "fbias1": jnp.zeros((1, L2), jnp.float32) + 0.01,
        # value head (no bias)
        "vw": nrm(jax.random.fold_in(key, 99), (L2, 1)),
    }
    return params


def reference_forward(state, policy, params):
    """Pure-JAX f32 reference of one forward() call (for a sanity check)."""
    def bn(x, g, b):
        m = jnp.mean(x, 0, keepdims=True)
        v = jnp.mean((x - m) ** 2, 0, keepdims=True)
        return (x - m) * jax.lax.rsqrt(v + BN_EPS) * g + b

    z = policy @ params["pw1"]
    z = jnp.maximum(bn(z, params["pg1"], params["pb1"]), 0.0)
    z = bn(z @ params["pw2"], params["pg2"], params["pb2"])

    s = state @ params["sw1"]
    s = jnp.maximum(bn(s, params["sg1"], params["sb1"]), 0.0)
    s = bn(s @ params["sw2"], params["sg2"], params["sb2"])

    x = jnp.maximum(jnp.concatenate([s, z], axis=-1), 0.0)
    h = jnp.maximum(bn(x @ params["fw0"], params["fg0"], params["fb0"]), 0.0)
    phi = h @ params["fw1"] + params["fbias1"]
    value = phi @ params["vw"]
    return value, phi


if __name__ == "__main__":
    # hparams
    obs_dim = 10
    weight_shapes = [(4, 8), (8, 2)]
    bias_shapes = [(8,), (2,)]
    context_dim = sum(a * b for a, b in weight_shapes) + sum(s[0] for s in bias_shapes)  # 58
    layers_size = [32, 32, 16]
    latent_dim = layers_size[0] // 2  # state_based_value = True
    num_calls = 4   # independent forward() calls fused into one pallas_call grid
    batch = 8       # per-call batch

    key = jax.random.PRNGKey(0)
    k_state, k_policy, k_params = jax.random.split(key, 3)
    state = jax.random.normal(k_state, (num_calls, batch, obs_dim), dtype=jnp.float32)
    policy = jax.random.normal(k_policy, (num_calls, batch, context_dim), dtype=jnp.float32)
    params = make_params(k_params, obs_dim, context_dim, latent_dim, layers_size)

    # One-time parameter packing (cached across steps in real use).
    w_slab, p_slab = pack_weight_slabs(params, obs_dim, context_dim, latent_dim, layers_size)

    value, phi = neural_bandit_forward(
        state, policy, w_slab, p_slab, obs_dim, context_dim, layers_size[-1]
    )
    jax.block_until_ready((value, phi))

    ref_value, ref_phi = jax.vmap(lambda s, p: reference_forward(s, p, params))(state, policy)

    assert value.shape == (num_calls, batch, 1)
    assert phi.shape == (num_calls, batch, layers_size[-1])
    # bf16 matmul operands (f32 accumulation) -> relaxed tolerance vs the f32 reference.
    assert jnp.allclose(value, ref_value, atol=6e-2, rtol=6e-2), \
        float(jnp.max(jnp.abs(value - ref_value)))
    assert jnp.allclose(phi, ref_phi, atol=6e-2, rtol=6e-2), \
        float(jnp.max(jnp.abs(phi - ref_phi)))

    print("KERNEL_OK")
</pallas_src>

<mosaic_0001>
module attributes {stable_mosaic.version = 11 : i64} {
  func.func @bandit_kernel(%arg0: i32, %arg1: memref<8x128xf32, #tpu.memory_space<vmem>>, %arg2: memref<224x128xbf16, #tpu.memory_space<vmem>>, %arg3: memref<8x128xf32, #tpu.memory_space<vmem>>, %arg4: memref<8x128xf32, #tpu.memory_space<vmem>>) attributes {dimension_semantics = [#tpu.dimension_semantics<parallel>], iteration_bounds = array<i64: 4>, scalar_prefetch = 0 : i64, scratch_operands = 0 : i64, tpu.core_type = #tpu.core_type<tc>, window_params = [{transform_indices = @transform_0, window_bounds = array<i64: 8, 128>}, {pipeline_mode = #tpu.pipeline_mode<synchronous>, transform_indices = @transform_1, window_bounds = array<i64: 224, 128>}, {pipeline_mode = #tpu.pipeline_mode<synchronous>, transform_indices = @transform_2, window_bounds = array<i64: 8, 128>}, {transform_indices = @transform_3, window_bounds = array<i64: 8, 128>}]} {
    %c0 = arith.constant 0 : index
    %c0_0 = arith.constant 0 : index
    %0 = vector.load %arg3[%c0, %c0_0] : memref<8x128xf32, #tpu.memory_space<vmem>>, vector<8x128xf32>
    %1 = vector.extract_strided_slice %0 {offsets = [0, 0], sizes = [1, 128], strides = [1, 1]} : vector<8x128xf32> to vector<1x128xf32>
    %2 = vector.extract_strided_slice %0 {offsets = [1, 0], sizes = [1, 128], strides = [1, 1]} : vector<8x128xf32> to vector<1x128xf32>
    %3 = vector.extract_strided_slice %0 {offsets = [2, 0], sizes = [1, 128], strides = [1, 1]} : vector<8x128xf32> to vector<1x128xf32>
    %4 = vector.extract_strided_slice %0 {offsets = [3, 0], sizes = [1, 128], strides = [1, 1]} : vector<8x128xf32> to vector<1x128xf32>
    %5 = vector.extract_strided_slice %0 {offsets = [4, 0], sizes = [1, 128], strides = [1, 1]} : vector<8x128xf32> to vector<1x128xf32>
    %6 = vector.extract_strided_slice %0 {offsets = [5, 0], sizes = [1, 128], strides = [1, 1]} : vector<8x128xf32> to vector<1x128xf32>
    %7 = vector.extract_strided_slice %0 {offsets = [6, 0], sizes = [1, 128], strides = [1, 1]} : vector<8x128xf32> to vector<1x128xf32>
    %c0_1 = arith.constant 0 : index
    %c0_2 = arith.constant 0 : index
    %8 = vector.load %arg2[%c0_1, %c0_2] : memref<224x128xbf16, #tpu.memory_space<vmem>>, vector<128x128xbf16>
    %c128 = arith.constant 128 : index
    %c0_3 = arith.constant 0 : index
    %9 = vector.load %arg2[%c128, %c0_3] : memref<224x128xbf16, #tpu.memory_space<vmem>>, vector<32x128xbf16>
    %c160 = arith.constant 160 : index
    %c0_4 = arith.constant 0 : index
    %10 = vector.load %arg2[%c160, %c0_4] : memref<224x128xbf16, #tpu.memory_space<vmem>>, vector<32x128xbf16>
    %c192 = arith.constant 192 : index
    %c0_5 = arith.constant 0 : index
    %11 = vector.load %arg2[%c192, %c0_5] : memref<224x128xbf16, #tpu.memory_space<vmem>>, vector<32x128xbf16>
    %c0_6 = arith.constant 0 : index
    %c0_7 = arith.constant 0 : index
    %12 = vector.load %arg1[%c0_6, %c0_7] : memref<8x128xf32, #tpu.memory_space<vmem>>, vector<8x128xf32>
    %13 = arith.truncf %12 : vector<8x128xf32> to vector<8x128xbf16>
    %cst = arith.constant dense<0.000000e+00> : vector<8x128xf32>
    %14 = tpu.matmul %13, %8, %cst {dimension_numbers = #tpu.dot_dimension_numbers<[1], [0], [0], [1], [0, 0, 1, 1], [], []>} : vector<8x128xbf16>, vector<128x128xbf16>, vector<8x128xf32> -> vector<8x128xf32>
    %cst_8 = arith.constant dense<0.000000e+00> : vector<128xf32>
    %15 = vector.multi_reduction <add>, %14, %cst_8 [0] : vector<8x128xf32> to vector<128xf32>
    %16 = vector.shape_cast %15 : vector<128xf32> to vector<1x128xf32>
    %cst_9 = arith.constant 1.250000e-01 : f32
    %17 = vector.broadcast %cst_9 : f32 to vector<1x128xf32>
    %18 = arith.mulf %16, %17 : vector<1x128xf32>
    %19 = arith.mulf %14, %14 : vector<8x128xf32>
    %cst_10 = arith.constant dense<0.000000e+00> : vector<128xf32>
    %20 = vector.multi_reduction <add>, %19, %cst_10 [0] : vector<8x128xf32> to vector<128xf32>
    %21 = vector.shape_cast %20 : vector<128xf32> to vector<1x128xf32>
    %cst_11 = arith.constant 1.250000e-01 : f32
    %22 = vector.broadcast %cst_11 : f32 to vector<1x128xf32>
    %23 = arith.mulf %21, %22 : vector<1x128xf32>
    %24 = arith.mulf %18, %18 : vector<1x128xf32>
    %25 = arith.subf %23, %24 : vector<1x128xf32>
    %cst_12 = arith.constant 9.99999974E-6 : f32
    %26 = vector.broadcast %cst_12 : f32 to vector<1x128xf32>
    %27 = arith.addf %25, %26 : vector<1x128xf32>
    %28 = math.rsqrt %27 : vector<1x128xf32>
    %29 = arith.mulf %1, %28 : vector<1x128xf32>
    %30 = arith.mulf %18, %29 : vector<1x128xf32>
    %31 = arith.subf %2, %30 : vector<1x128xf32>
    %32 = vector.broadcast %29 : vector<1x128xf32> to vector<8x128xf32>
    %33 = arith.mulf %14, %32 : vector<8x128xf32>
    %34 = vector.broadcast %31 : vector<1x128xf32> to vector<8x128xf32>
    %35 = arith.addf %33, %34 : vector<8x128xf32>
    %cst_13 = arith.constant 0.000000e+00 : f32
    %36 = vector.broadcast %cst_13 : f32 to vector<8x128xf32>
    %37 = arith.maximumf %35, %36 : vector<8x128xf32>
    %38 = vector.extract_strided_slice %37 {offsets = [0, 0], sizes = [8, 32], strides = [1, 1]} : vector<8x128xf32> to vector<8x32xf32>
    %39 = arith.truncf %38 : vector<8x32xf32> to vector<8x32xbf16>
    %cst_14 = arith.constant dense<0.000000e+00> : vector<8x128xf32>
    %40 = tpu.matmul %39, %9, %cst_14 {dimension_numbers = #tpu.dot_dimension_numbers<[1], [0], [0], [1], [0, 0, 1, 1], [], []>} : vector<8x32xbf16>, vector<32x128xbf16>, vector<8x128xf32> -> vector<8x128xf32>
    %cst_15 = arith.constant dense<0.000000e+00> : vector<128xf32>
    %41 = vector.multi_reduction <add>, %40, %cst_15 [0] : vector<8x128xf32> to vector<128xf32>
    %42 = vector.shape_cast %41 : vector<128xf32> to vector<1x128xf32>
    %cst_16 = arith.constant 1.250000e-01 : f32
    %43 = vector.broadcast %cst_16 : f32 to vector<1x128xf32>
    %44 = arith.mulf %42, %43 : vector<1x128xf32>
    %45 = arith.mulf %40, %40 : vector<8x128xf32>
    %cst_17 = arith.constant dense<0.000000e+00> : vector<128xf32>
    %46 = vector.multi_reduction <add>, %45, %cst_17 [0] : vector<8x128xf32> to vector<128xf32>
    %47 = vector.shape_cast %46 : vector<128xf32> to vector<1x128xf32>
    %cst_18 = arith.constant 1.250000e-01 : f32
    %48 = vector.broadcast %cst_18 : f32 to vector<1x128xf32>
    %49 = arith.mulf %47, %48 : vector<1x128xf32>
    %50 = arith.mulf %44, %44 : vector<1x128xf32>
    %51 = arith.subf %49, %50 : vector<1x128xf32>
    %cst_19 = arith.constant 9.99999974E-6 : f32
    %52 = vector.broadcast %cst_19 : f32 to vector<1x128xf32>
    %53 = arith.addf %51, %52 : vector<1x128xf32>
    %54 = math.rsqrt %53 : vector<1x128xf32>
    %55 = arith.mulf %3, %54 : vector<1x128xf32>
    %56 = arith.mulf %44, %55 : vector<1x128xf32>
    %57 = arith.subf %4, %56 : vector<1x128xf32>
    %58 = vector.broadcast %55 : vector<1x128xf32> to vector<8x128xf32>
    %59 = arith.mulf %40, %58 : vector<8x128xf32>
    %60 = vector.broadcast %57 : vector<1x128xf32> to vector<8x128xf32>
    %61 = arith.addf %59, %60 : vector<8x128xf32>
    %cst_20 = arith.constant 0.000000e+00 : f32
    %62 = vector.broadcast %cst_20 : f32 to vector<8x128xf32>
    %63 = arith.maximumf %61, %62 : vector<8x128xf32>
    %64 = vector.extract_strided_slice %63 {offsets = [0, 0], sizes = [8, 32], strides = [1, 1]} : vector<8x128xf32> to vector<8x32xf32>
    %65 = arith.truncf %64 : vector<8x32xf32> to vector<8x32xbf16>
    %cst_21 = arith.constant dense<0.000000e+00> : vector<8x128xf32>
    %66 = tpu.matmul %65, %10, %cst_21 {dimension_numbers = #tpu.dot_dimension_numbers<[1], [0], [0], [1], [0, 0, 1, 1], [], []>} : vector<8x32xbf16>, vector<32x128xbf16>, vector<8x128xf32> -> vector<8x128xf32>
    %cst_22 = arith.constant dense<0.000000e+00> : vector<128xf32>
    %67 = vector.multi_reduction <add>, %66, %cst_22 [0] : vector<8x128xf32> to vector<128xf32>
    %68 = vector.shape_cast %67 : vector<128xf32> to vector<1x128xf32>
    %cst_23 = arith.constant 1.250000e-01 : f32
    %69 = vector.broadcast %cst_23 : f32 to vector<1x128xf32>
    %70 = arith.mulf %68, %69 : vector<1x128xf32>
    %71 = arith.mulf %66, %66 : vector<8x128xf32>
    %cst_24 = arith.constant dense<0.000000e+00> : vector<128xf32>
    %72 = vector.multi_reduction <add>, %71, %cst_24 [0] : vector<8x128xf32> to vector<128xf32>
    %73 = vector.shape_cast %72 : vector<128xf32> to vector<1x128xf32>
    %cst_25 = arith.constant 1.250000e-01 : f32
    %74 = vector.broadcast %cst_25 : f32 to vector<1x128xf32>
    %75 = arith.mulf %73, %74 : vector<1x128xf32>
    %76 = arith.mulf %70, %70 : vector<1x128xf32>
    %77 = arith.subf %75, %76 : vector<1x128xf32>
    %cst_26 = arith.constant 9.99999974E-6 : f32
    %78 = vector.broadcast %cst_26 : f32 to vector<1x128xf32>
    %79 = arith.addf %77, %78 : vector<1x128xf32>
    %80 = math.rsqrt %79 : vector<1x128xf32>
    %81 = arith.mulf %5, %80 : vector<1x128xf32>
    %82 = arith.mulf %70, %81 : vector<1x128xf32>
    %83 = arith.subf %6, %82 : vector<1x128xf32>
    %84 = vector.broadcast %81 : vector<1x128xf32> to vector<8x128xf32>
    %85 = arith.mulf %66, %84 : vector<8x128xf32>
    %86 = vector.broadcast %83 : vector<1x128xf32> to vector<8x128xf32>
    %87 = arith.addf %85, %86 : vector<8x128xf32>
    %cst_27 = arith.constant 0.000000e+00 : f32
    %88 = vector.broadcast %cst_27 : f32 to vector<8x128xf32>
    %89 = arith.maximumf %87, %88 : vector<8x128xf32>
    %90 = vector.extract_strided_slice %89 {offsets = [0, 0], sizes = [8, 32], strides = [1, 1]} : vector<8x128xf32> to vector<8x32xf32>
    %91 = arith.truncf %90 : vector<8x32xf32> to vector<8x32xbf16>
    %cst_28 = arith.constant dense<0.000000e+00> : vector<8x128xf32>
    %92 = tpu.matmul %91, %11, %cst_28 {dimension_numbers = #tpu.dot_dimension_numbers<[1], [0], [0], [1], [0, 0, 1, 1], [], []>} : vector<8x32xbf16>, vector<32x128xbf16>, vector<8x128xf32> -> vector<8x128xf32>
    %93 = vector.broadcast %7 : vector<1x128xf32> to vector<8x128xf32>
    %94 = arith.addf %92, %93 : vector<8x128xf32>
    %c0_29 = arith.constant 0 : index
    %c0_30 = arith.constant 0 : index
    %95 = vector.load %arg4[%c0_29, %c0_30] : memref<8x128xf32, #tpu.memory_space<vmem>>, vector<8x128xf32>
    tpu.vector_store %arg4[%c0_29, %c0_30], %94 {strides = array<i32>} : memref<8x128xf32, #tpu.memory_space<vmem>>, vector<8x128xf32>,
    return
  }
  func.func @transform_0(%arg0: i32) -> (i32, i32) {
    %c0_i32 = arith.constant 0 : i32
    %c0_i32_0 = arith.constant 0 : i32
    return %arg0, %c0_i32 : i32, i32
  }
  func.func @transform_1(%arg0: i32) -> (i32, i32) {
    %c0_i32 = arith.constant 0 : i32
    %c0_i32_0 = arith.constant 0 : i32
    %c0_i32_1 = arith.constant 0 : i32
    return %c0_i32, %c0_i32_0 : i32, i32
  }
  func.func @transform_2(%arg0: i32) -> (i32, i32) {
    %c0_i32 = arith.constant 0 : i32
    %c0_i32_0 = arith.constant 0 : i32
    %c0_i32_1 = arith.constant 0 : i32
    return %c0_i32, %c0_i32_0 : i32, i32
  }
  func.func @transform_3(%arg0: i32) -> (i32, i32) {
    %c0_i32 = arith.constant 0 : i32
    %c0_i32_0 = arith.constant 0 : i32
    return %arg0, %c0_i32 : i32, i32
  }
}

</mosaic_0001>

<bundles_post_ra>
// kernel: tpu_custom_call.1
= control target key start
LH: loop header
LB: loop body
LE: loop exit
PB: predicated region body
PF: predicated region fallthrough
CT: control target
= control target key end

     0   :  { %8 = vsyncpa [#allocation3], 0  ;;  %s1133_s0 = inlined_call_operand.hbm [shape: f32[32,128], index: 0, kind: input, shape index: {}]   ;;  %s1134_s1 = inlined_call_operand.hbm [shape: bf16[224,128], index: 1, kind: input, shape index: {}]   ;;  %s1135_s2 = inlined_call_operand.hbm [shape: f32[8,128], index: 2, kind: input, shape index: {}]   ;;  %s1136_s3 = inlined_call_operand.hbm [shape: f32[32,128], index: 3, kind: output, shape index: {}]  }
   0x1   :  { %10 = vsyncpa [#allocation3 + $0x1], 0 }
   0x2   :  { %11 = vsyncpa [#allocation6], 0 }
   0x3   :  { %12 = vsyncpa [#allocation4], 0 }
   0x4   :  { %14 = vsyncpa [#allocation4 + $0x1], 0  ;;  %s974_s12 = smov 0   ;;  %s976_s13 = smov 0  }
   0x5   :  { %s978_s14 = smov 0   ;;  %s980_s15 = smov 0  }
   0x6 LB: > { %s130_s18 = sshll.u32 %s1134_s1, 4  ;;  %s998_s19 = sadd.s32 4294967295, %s948_s15   ;;  %s948_s15 = sphi %s980_s15, %s1146_s15   ;;  %s944_s14 = sphi %s978_s14, %s1145_s14   ;;  %s940_s13 = sphi %s976_s13, %s1144_s13   ;;  %s936_s12 = sphi %s974_s12, %s1143_s12   ;;  %s131_s18 = int_to_ptr.hbm [resolvable:$true] %s130_s18 }
   0x7   : > { %p625_p0 = scmp.ge.s32.totalorder %s948_s15, 1  ;;  %p41_p1 = scmp.eq.s32.totalorder %s998_s19, 0 }
   0x8   : > { %p119_p2 = scmp.lt.s32.totalorder %s948_s15, 5  ;;  %s950_s21 = smov [#allocation5]  }
   0x9   : > { %s132_s22 = sshll.u32 %s950_s21, 4  ;;  %s145_s25 = sshll.u32 %s1135_s2, 4  ;;  %s133_s22 = int_to_ptr.vmem [resolvable:$true] %s132_s22  ;;  %s146_s25 = int_to_ptr.hbm [resolvable:$true] %s145_s25 }
   0xa   : > { %p1003_p3 = pnand %p625_p0, %p119_p2  ;;  %s951_s26 = smov [#allocation7]  }
   0xb   : > { %s147_s27 = sshll.u32 %s951_s26, 4  ;;  %s952_s28 = smov 64   ;;  %s148_s27 = int_to_ptr.vmem [resolvable:$true] %s147_s27 }
   0xc   : > { %p725_p4 = pneg %p1003_p3  ;;  %s953_s29 = smov 4  }
   0xd   : > { %s624_s30 = sadd.s32 4294967294, %s948_s15   ;;  %s1016_s4 = sadd.s32 1, %s948_s15  }
   0xe   : > { %p726_p5 = pnand %p725_p4, %p41_p1  ;;  %s24_s5 = ssub.s32 %s948_s15, %s1016_s4 }
   0xf   : > { %s27_s6 = sadd.s32 1, %s944_s14  ;;  %p25_p6 = scmp.eq.s32.totalorder %s24_s5, 0 }
  0x10   : > { %728 = dma.hbm_to_vmem [thread:$0]  (!%p726_p5), %s131_s18, 1792, %s133_s22, [#allocation6], %s952_s28, %s952_s28, %s953_s29  }
  0x11   : > { %731 = dma.hbm_to_vmem [thread:$0]  (!%p726_p5), %s146_s25, 128, %s148_s27, [#allocation6]  }
  0x12   : > { %p34_p7 = scmp.ne.s32.totalorder %s944_s14, %s940_s13  ;;  %p35_p8 = scmp.eq.s32.totalorder %s948_s15, 0 }
  0x13   : > { %p40_p9 = scmp.ne.s32.totalorder %s940_s13, %s936_s12  ;;  %p106_p12 = scmp.eq.s32.totalorder %s998_s19, 3 }
  0x14   : > { %s1027_s7 = scalar_select %p25_p6, %s944_s14, %s27_s6  }
  0x15   : > { %p1029_p10 = por %p35_p8, %p34_p7  ;;  %p1035_p11 = por %p41_p1, %p40_p9 }
  0x16   : > { %p112_p13 = scmp.eq.s32.totalorder %s624_s30, 3  ;;  %p742_p0 = scmp.lt.s32.totalorder %s948_s15, 4 }
  0x17   : > { %s158_s10 = sand.u32 1, %s944_s14   ;;  %p1042_p2 = por %p106_p12, %p34_p7 }
  0x18   : > { %p1046_p4 = por %p112_p13, %p40_p9  ;;  %s629_s17 = sshll.u32 %s158_s10, 3 }
  0x19   : > { %s630_s18 = sshll.u32 %s948_s15, 3  ;;  %s162_s24 = scalar_lea.vmem [#allocation2], %s629_s17 }
  0x1a   : > { %s166_s23 = scalar_lea.hbm %s1133_s0, %s630_s18  ;;  %s170_s25 = sshll.u32 %s162_s24, 4  ;;  %s171_s25 = int_to_ptr.vmem [resolvable:$true] %s170_s25 }
  0x1b   : > { %s168_s26 = sshll.u32 %s166_s23, 4  ;;  %p1056_p5 = pnand %p742_p0, %p1029_p10  ;;  %s169_s26 = int_to_ptr.hbm [resolvable:$true] %s168_s26 }
  0x1c   : > { %s159_s28 = scalar_lea.sflag [#allocation3], %s158_s10  ;;  %s848_s29 = sshra.s32 %s169_s26, 4  ;;  %s849_s29 = int_to_ptr.hbm [resolvable:$true] %s848_s29 }
  0x1d   : > { %s850_s30 = scalar_lea.hbm %s849_s29, 8  ;;  %p852_p7 = pneg %p1056_p5 }
  0x1e   : > { %p851_p6 = scmp.ne.s32.totalorder %s849_s29, %s850_s30  ;;  %s855_s17 = scalar_lea.hbm %s1133_s0, 32 }
  0x1f   : > { %p856_p10 = scmp.lt.s32.totalorder %s849_s29, %s1133_s0  ;;  %p857_p12 = scmp.lt.s32.totalorder %s855_s17, %s850_s30 }
  0x20   : > { %p853_p8 = pnand %p852_p7, %p851_p6 }
  0x21   : > { %p858_p13 = por %p857_p12, %p856_p10 }
  0x22   : > { %p854_p9 = pneg %p853_p8 }
  0x24   : > { %p859_p0 = pnand %p858_p13, %p854_p9 }
  0x26   : > { %862 = shalt.err (!%p859_p0)
}
  0x27   : > { %735 = dma.hbm_to_vmem [thread:$0]  (!%p1056_p5), %s169_s26, 128, %s171_s25, %s159_s28  }
  0x28   : > { %179 = sbr.rel (%p1003_p3) target bundleno = 766 (0x2fe), region = 32  ;;  %s1073_s10 = sand.u32 (!%p1003_p3), 1, %s940_s13  }
  0x29   : > { %s632_s21 = sshll.u32 (!%p1003_p3), %s1073_s10, 3  ;;  %s182_s22 = scalar_lea.sflag (!%p1003_p3), [#allocation3], %s1073_s10 }
  0x2a   : > { %s185_s23 = scalar_lea.vmem (!%p1003_p3), [#allocation2], %s632_s21 }
  0x2d   : > { %923 = dma.done.wait (%p1035_p11), %s182_s22, 128  }
  0x2e   : > { %925 = vsyncadd (%p1035_p11), %s182_s22, 4294967168 }
  0x2f   : > { %927 = dma.done.wait (%p41_p1), [#allocation6], 1920  }
  0x30   : > { %929 = vsyncadd (%p41_p1), [#allocation6], 4294965376  ;;  %v706_v0 = vld [vmem:[#allocation5 + $0x38] sm:$0xff]  ;;  %v705_v1 = vld [vmem:[#allocation5 + $0x30] sm:$0xff]  ;;  %vm364_vm3 = vcmask 261120   ;;  %s696_s20 = sshll.u32 %s998_s19, 3 }
  0x31   : > { %299 = vmatpush.bf16.msra.mxu0 %v706_v0  ;;  %v704_v2 = vld [vmem:[#allocation5 + $0x28] sm:$0xff]  ;;  %v703_v3 = vld [vmem:[#allocation5 + $0x20] sm:$0xff]  ;;  %v702_v4 = vld [vmem:[#allocation5 + $0x18] sm:$0xff]  ;;  %s530_s25 = scalar_lea.hbm %s1136_s3, %s696_s20  ;;  %s218_s26 = scalar_lea.vmem [#allocation8], %s632_s21 }
  0x32   : > { %v701_v5 = vld [vmem:[#allocation5 + $0x10] sm:$0xff]  ;;  %v700_v6 = vld [vmem:[#allocation5 + $0x8] sm:$0xff]  ;;  %v699_v7 = vld [vmem:[#allocation5] sm:$0xff]  ;;  %s532_s27 = sshll.u32 %s218_s26, 4  ;;  %s534_s28 = sshll.u32 %s530_s25, 4  ;;  %s533_s27 = int_to_ptr.vmem [resolvable:$true] %s532_s27  ;;  %s535_s28 = int_to_ptr.hbm [resolvable:$true] %s534_s28 }
  0x33   : > { %v249_v8 = vld [vmem:[%s185_s23] sm:$0xff]  ;;  %v708_v24 = vld [vmem:[#allocation5 + $0x48] sm:$0xff]  ;;  %v707_v27 = vld [vmem:[#allocation5 + $0x40] sm:$0xff]  ;;  %s520_s29 = scalar_lea.sflag [#allocation4], %s1073_s10  ;;  %s892_s30 = sshra.s32 %s535_s28, 4  ;;  %s893_s30 = int_to_ptr.hbm [resolvable:$true] %s892_s30 }
  0x34   : > { %v250_v9 = vpack.c.bf16 %v249_v8, %v249_v8  ;;  %374 = vmatpush.bf16.msra.mxu1 %v708_v24  ;;  %v1087_v37 = vld [vmem:[#allocation7] sm:$0xff]  ;;  %v710_v0 = vld [vmem:[#allocation5 + $0x58] sm:$0xff]  ;;  %s894_s19 = scalar_lea.hbm %s893_s30, 8  ;;  %s898_s17 = scalar_lea.hbm %s1136_s3, 32 }
  0x35   : > { %300 = vmatpush.bf16.msra.mxu0 %v705_v1  ;;  %442 = vmatpush.bf16.msra.mxu2 %v710_v0  ;;  %p895_p1 = scmp.ne.s32.totalorder %s893_s30, %s894_s19  ;;  %p899_p5 = scmp.lt.s32.totalorder %s893_s30, %s1136_s3 }
  0x36   : > { %p900_p6 = scmp.lt.s32.totalorder %s898_s17, %s894_s19 }
  0x37   : > { %p896_p3 = pnand %p895_p1, %p1042_p2 }
  0x38   : > { %375 = vmatpush.bf16.msra.mxu1 %v707_v27  ;;  %p901_p7 = por %p900_p6, %p899_p5 }
  0x39   : > { %301 = vmatpush.bf16.msra.mxu0 %v704_v2  ;;  %p897_p11 = pneg %p896_p3 }
  0x3b   : > { %p902_p8 = pnand %p901_p7, %p897_p11 }
  0x3d   : > { %302 = vmatpush.bf16.msra.mxu0 %v703_v3  ;;  %v709_v3 = vld [vmem:[#allocation5 + $0x50] sm:$0xff] }
  0x3e   : > { %443 = vmatpush.bf16.msra.mxu2 %v709_v3 }
  0x41   : > { %303 = vmatpush.bf16.msra.mxu0 %v702_v4 }
  0x45   : > { %304 = vmatpush.bf16.msra.mxu0 %v701_v5 }
  0x49   : > { %305 = vmatpush.bf16.msra.mxu0 %v700_v6 }
  0x4d   : > { %306 = vmatpush.bf16.msra.mxu0 %v699_v7 }
  0x50   : > { %307 = vmatmul.bf16.vlgmr.msra.gmra.mxu0 %v250_v9 }
  0xcd   : > { %v308_v10 = vpop.f32.mrf.mxu0 }
  0xce   : > { %v312_v11 = vrot.slane %v308_v10, 4  ;;  %v319_v12 = vmul.f32 %v308_v10, %v308_v10 }
  0xd0   : > { %v313_v13 = vadd.f32 %v312_v11, %v308_v10  ;;  %v320_v14 = vrot.slane %v319_v12, 4 }
  0xd2   : > { %v314_v15 = vrot.slane %v313_v13, 2  ;;  %v321_v16 = vadd.f32 %v320_v14, %v319_v12 }
  0xd4   : > { %v315_v17 = vadd.f32 %v314_v15, %v313_v13  ;;  %v322_v18 = vrot.slane %v321_v16, 2 }
  0xd5   : > { %v310_v19 = vpop.f32.mrf.mxu0 }
  0xd6   : > { %v316_v20 = vrot.slane %v315_v17, 1  ;;  %v323_v21 = vadd.f32 %v322_v18, %v321_v16 }
  0xd8   : > { %v317_v22 = vadd.f32 %v316_v20, %v315_v17  ;;  %v324_v23 = vrot.slane %v323_v21, 1 }
  0xda   : > { %v318_v25 = vmul.f32 0.125, %v317_v22  ;;  %v325_v26 = vadd.f32 %v324_v23, %v323_v21 }
  0xdc   : > { %v326_v28 = vmul.f32 0.125, %v325_v26  ;;  %v327_v29 = vmul.f32 %v318_v25, %v318_v25 }
  0xde   : > { %v328_v30 = vsub.f32 %v326_v28, %v327_v29 }
  0xe0   : > { %v329_v31 = vadd.f32 1e-05, %v328_v30 }
  0xe2   : > { %782 = vrsqrt.f32 %v329_v31  ;;  %vm336_vm1 = vweird.f32 %v329_v31 }
  0xe8   : > { %v783_v32 = vpop.eup %782 }
  0xe9   : > { %v331_v33 = vmul.f32 %v783_v32, %v329_v31  ;;  %vm337_vm0 = vweird.f32 %v783_v32 }
  0xea   : > { %vm338_vm2 = vmor %vm336_vm1, %vm337_vm0 }
  0xeb   : > { %v332_v34 = vmul.f32 %v783_v32, %v331_v33 }
  0xed   : > { %v333_v35 = vmul.f32 0.5, %v332_v34 }
  0xef   : > { %v334_v36 = vsub.f32 1.5, %v333_v35 }
  0xf1   : > { %v335_v38 = vmul.f32 %v783_v32, %v334_v36 }
  0xf3   : > { %v339_v39 = vsel %vm338_vm2, %v783_v32, %v335_v38 }
  0xf4   : > { %v340_v40 = vmul.f32 %v339_v39, %v1087_v37 }
  0xf6   : > { %v341_v41 = vmul.f32 %v340_v40, %v318_v25  ;;  %v346_v42 = vperm.slane %v340_v40, 0  ;;  %v712_v40 = vld [vmem:[#allocation5 + $0x68] sm:$0xff] }
  0xf7   : > { %511 = vmatpush.bf16.msra.mxu3 %v712_v40 }
  0xf8   : > { %v343_v43 = vrot.slane %v341_v41, 7  ;;  %v347_v45 = vmul.f32 %v346_v42, %v308_v10 }
  0xfa   : > { %v345_v44 = vsub.f32 %v1087_v37, %v343_v43  ;;  %v711_v43 = vld [vmem:[#allocation5 + $0x60] sm:$0xff] }
  0xfb   : > { %512 = vmatpush.bf16.msra.mxu3 %v711_v43 }
  0xfc   : > { %v348_v46 = vperm.slane %v345_v44, 1 }
  0xfe   : > { %v349_v47 = vadd.f32 %v348_v46, %v347_v45 }
 0x100   : > { %v350_v48 = vmax.f32 %v349_v47, 0.0 }
 0x102   : > { %v351_v49 = vpack.c.bf16 %v350_v48, %v350_v48 }
 0x104   : > { %676 = vmatmul.msk.bf16.vlgmr.msra.gmra.mxu1 %vm364_vm3, %v351_v49 }
 0x181   : > { %v377_v50 = vpop.f32.mrf.mxu1 }
 0x182   : > { %v381_v51 = vrot.slane %v377_v50, 4  ;;  %v388_v52 = vmul.f32 %v377_v50, %v377_v50 }
 0x184   : > { %v382_v53 = vadd.f32 %v381_v51, %v377_v50  ;;  %v389_v54 = vrot.slane %v388_v52, 4 }
 0x186   : > { %v383_v55 = vrot.slane %v382_v53, 2  ;;  %v390_v56 = vadd.f32 %v389_v54, %v388_v52 }
 0x188   : > { %v384_v57 = vadd.f32 %v383_v55, %v382_v53  ;;  %v391_v58 = vrot.slane %v390_v56, 2 }
 0x189   : > { %v379_v59 = vpop.f32.mrf.mxu1 }
 0x18a   : > { %v385_v60 = vrot.slane %v384_v57, 1  ;;  %v392_v61 = vadd.f32 %v391_v58, %v390_v56 }
 0x18c   : > { %v386_v62 = vadd.f32 %v385_v60, %v384_v57  ;;  %v393_v63 = vrot.slane %v392_v61, 1 }
 0x18e   : > { %v387_v1 = vmul.f32 0.125, %v386_v62  ;;  %v394_v2 = vadd.f32 %v393_v63, %v392_v61 }
 0x190   : > { %v395_v4 = vmul.f32 0.125, %v394_v2  ;;  %v396_v5 = vmul.f32 %v387_v1, %v387_v1 }
 0x192   : > { %v397_v6 = vsub.f32 %v395_v4, %v396_v5 }
 0x194   : > { %v398_v7 = vadd.f32 1e-05, %v397_v6 }
 0x196   : > { %784 = vrsqrt.f32 %v398_v7  ;;  %vm405_vm5 = vweird.f32 %v398_v7 }
 0x19c   : > { %v785_v8 = vpop.eup %784 }
 0x19d   : > { %v400_v9 = vmul.f32 %v785_v8, %v398_v7  ;;  %vm406_vm4 = vweird.f32 %v785_v8 }
 0x19e   : > { %vm407_vm6 = vmor %vm405_vm5, %vm406_vm4 }
 0x19f   : > { %v401_v10 = vmul.f32 %v785_v8, %v400_v9 }
 0x1a1   : > { %v402_v11 = vmul.f32 0.5, %v401_v10 }
 0x1a3   : > { %v403_v12 = vsub.f32 1.5, %v402_v11 }
 0x1a5   : > { %v404_v13 = vmul.f32 %v785_v8, %v403_v12 }
 0x1a7   : > { %v408_v14 = vsel %vm407_vm6, %v785_v8, %v404_v13 }
 0x1a8   : > { %v409_v15 = vmul.f32 %v408_v14, %v1087_v37 }
 0x1aa   : > { %v410_v16 = vmul.f32 %v409_v15, %v387_v1  ;;  %v415_v17 = vperm.slane %v409_v15, 2  ;;  %v489_v1 = vperm.slane %v1087_v37, 6 }
 0x1ac   : > { %v412_v18 = vrot.slane %v410_v16, 7  ;;  %v416_v20 = vmul.f32 %v415_v17, %v377_v50 }
 0x1ae   : > { %v414_v19 = vsub.f32 %v1087_v37, %v412_v18 }
 0x1b0   : > { %v417_v21 = vperm.slane %v414_v19, 3 }
 0x1b2   : > { %v418_v22 = vadd.f32 %v417_v21, %v416_v20 }
 0x1b4   : > { %v419_v23 = vmax.f32 %v418_v22, 0.0 }
 0x1b6   : > { %v420_v24 = vpack.c.bf16 %v419_v23, %v419_v23 }
 0x1b8   : > { %685 = vmatmul.msk.bf16.vlgmr.msra.gmra.mxu2 %vm364_vm3, %v420_v24 }
 0x23b   : > { %v445_v25 = vpop.f32.mrf.mxu2 }
 0x23c   : > { %v449_v26 = vrot.slane %v445_v25, 4  ;;  %v456_v27 = vmul.f32 %v445_v25, %v445_v25 }
 0x23e   : > { %v450_v28 = vadd.f32 %v449_v26, %v445_v25  ;;  %v457_v29 = vrot.slane %v456_v27, 4 }
 0x240   : > { %v451_v30 = vrot.slane %v450_v28, 2  ;;  %v458_v31 = vadd.f32 %v457_v29, %v456_v27 }
 0x242   : > { %v452_v32 = vadd.f32 %v451_v30, %v450_v28  ;;  %v459_v33 = vrot.slane %v458_v31, 2 }
 0x243   : > { %v447_v34 = vpop.f32.mrf.mxu2 }
 0x244   : > { %v453_v35 = vrot.slane %v452_v32, 1  ;;  %v460_v36 = vadd.f32 %v459_v33, %v458_v31 }
 0x246   : > { %v454_v38 = vadd.f32 %v453_v35, %v452_v32  ;;  %v461_v39 = vrot.slane %v460_v36, 1 }
 0x248   : > { %v455_v41 = vmul.f32 0.125, %v454_v38  ;;  %v462_v42 = vadd.f32 %v461_v39, %v460_v36 }
 0x24a   : > { %v463_v44 = vmul.f32 0.125, %v462_v42  ;;  %v464_v45 = vmul.f32 %v455_v41, %v455_v41 }
 0x24c   : > { %v465_v46 = vsub.f32 %v463_v44, %v464_v45 }
 0x24e   : > { %v466_v47 = vadd.f32 1e-05, %v465_v46 }
 0x250   : > { %786 = vrsqrt.f32 %v466_v47  ;;  %vm473_vm8 = vweird.f32 %v466_v47 }
 0x256   : > { %v787_v48 = vpop.eup %786 }
 0x257   : > { %v468_v49 = vmul.f32 %v787_v48, %v466_v47  ;;  %vm474_vm7 = vweird.f32 %v787_v48 }
 0x258   : > { %vm475_vm9 = vmor %vm473_vm8, %vm474_vm7 }
 0x259   : > { %v469_v50 = vmul.f32 %v787_v48, %v468_v49 }
 0x25b   : > { %v470_v51 = vmul.f32 0.5, %v469_v50 }
 0x25d   : > { %v471_v52 = vsub.f32 1.5, %v470_v51 }
 0x25f   : > { %v472_v53 = vmul.f32 %v787_v48, %v471_v52 }
 0x261   : > { %v476_v54 = vsel %vm475_vm9, %v787_v48, %v472_v53 }
 0x262   : > { %v477_v55 = vmul.f32 %v476_v54, %v1087_v37 }
 0x264   : > { %v478_v56 = vmul.f32 %v477_v55, %v455_v41  ;;  %v483_v57 = vperm.slane %v477_v55, 4 }
 0x266   : > { %v480_v58 = vrot.slane %v478_v56, 7  ;;  %v484_v60 = vmul.f32 %v483_v57, %v445_v25 }
 0x268   : > { %v482_v59 = vsub.f32 %v1087_v37, %v480_v58 }
 0x26a   : > { %v485_v61 = vperm.slane %v482_v59, 5 }
 0x26c   : > { %v486_v62 = vadd.f32 %v485_v61, %v484_v60 }
 0x26e   : > { %v487_v63 = vmax.f32 %v486_v62, 0.0 }
 0x270   : > { %v488_v0 = vpack.c.bf16 %v487_v63, %v487_v63 }
 0x272   : > { %694 = vmatmul.msk.bf16.vlgmr.msra.gmra.mxu3 %vm364_vm3, %v488_v0 }
 0x2f5   : > { %v514_v2 = vpop.f32.mrf.mxu3 }
 0x2f6   : > { %v515_v3 = vadd.f32 %v514_v2, %v489_v1 }
 0x2f8   : > { %518 = vst [vmem:[%s218_s26] sm:$0xff] %v515_v3 }
 0x2f9   : > { %905 = shalt.err (!%p902_p8)
}
 0x2fa   : > { %723 = dma.vmem_to_hbm [thread:$0]  (%p1042_p2), %s533_s27, 128, %s535_s28, %s520_s29  }
 0x2fd   : > { %v516_v37 = vpop.f32.mrf.mxu3 }
 0x2fe PF: > { %p745_p9 = scmp.ge.s32.totalorder %s948_s15, 2  ;;  %s546_s10 = sand.u32 1, %s936_s12  }
 0x2ff   : > { %s547_s21 = scalar_lea.sflag [#allocation4], %s546_s10 }
 0x300   : > { %p737_p10 = pnand %p745_p9, %p1046_p4 }
 0x302   : > { %p738_p12 = pneg %p737_p10 }
 0x304   : > { %931 = dma.done.wait (%p738_p12), %s547_s21, 128  }
 0x305   : > { %933 = vsyncadd (%p738_p12), %s547_s21, 4294967168  ;;  %p17_p13 = scmp.ge.s32.totalorder %s1016_s4, 6   ;;  %s1143_s12 = smov %s940_s13 }
 0x306   : > { %s1144_s13 = smov %s944_s14  ;;  %s1145_s14 = smov %s1027_s7 }
 0x307   : > { %s1146_s15 = smov %s1016_s4  ;;  %19 = sbr.rel (!%p17_p13) target bundleno = 6 (0x6), region = 85 }
 0x30c   :  { %553 = vsyncpa [#allocation3], 1 }
 0x30d   :  { %555 = vsyncpa [#allocation3 + $0x1], 1 }
 0x30e   :  { %556 = vsyncpa [#allocation6], 1 }
 0x30f   :  { %557 = vsyncpa [#allocation4], 1 }
 0x310   :  { %559 = vsyncpa [#allocation4 + $0x1], 1 }

</bundles_post_ra>
